<compile_context>
chip_gen: v7x
topology: tpu7x:2x2x1
jax: 0.10.0
libtpu: 0.0.40
codegen_flags: <defaults>
</compile_context>

<pallas_src>
import functools

import jax
import jax.numpy as jnp
from jax.experimental import pallas as pl
from jax.experimental.pallas import tpu as pltpu

LANES = 128
TARGET_BLOCK_BYTES = 4 * 1024 * 1024  # ~4 MiB per input block per step.
CHUNK_ROWS = 128                      # in-kernel reduction chunk (64 KiB f32).


def _round_down(x: int, m: int) -> int:
    return (x // m) * m


def _make_mse_partial_kernel(tile_rows: int, chunk_rows: int,
                             last_tile_rows: int):
    """Kernel computing sum((r1-r2)^2) over one (tile_rows, 128) tile.

    `last_tile_rows` is the number of VALID rows in the final grid tile
    (static); the overhanging remainder of the last VMEM block is never read,
    so no masking is needed anywhere.
    """
    ragged = last_tile_rows != tile_rows

    def tile_sum(r1_ref, r2_ref, n_rows: int):
        # n_rows is a static Python int (tile_rows or last_tile_rows).
        num_chunks = n_rows // chunk_rows
        rem = n_rows - num_chunks * chunk_rows

        def sq_f32(start, nrows):
            a = r1_ref[pl.ds(start, nrows), :].astype(jnp.float32)
            b = r2_ref[pl.ds(start, nrows), :].astype(jnp.float32)
            d = a - b
            return d * d

        total = jnp.float32(0.0)
        if num_chunks > 0:
            # Chunked streaming reduce: fold each chunk into one (8,128) f32
            # vreg so temp usage is flat regardless of tile_rows.
            def body(c, acc):
                start = pl.multiple_of(c * chunk_rows, chunk_rows)
                sq = sq_f32(start, chunk_rows)
                return acc + jnp.sum(
                    sq.reshape(chunk_rows // 8, 8, LANES), axis=0)

            acc = jax.lax.fori_loop(0, num_chunks, body,
                                    jnp.zeros((8, LANES), jnp.float32))
            total = jnp.sum(acc)
        if rem > 0:
            # Static remainder (runs at most once per tile).
            sq = sq_f32(num_chunks * chunk_rows, rem)
            total = total + jnp.sum(sq)
        return total

    def kernel(r1_ref, r2_ref, out_ref):
        if not ragged:
            out_ref[0, 0] = tile_sum(r1_ref, r2_ref, tile_rows)
        else:
            is_last = pl.program_id(0) == pl.num_programs(0) - 1

            @pl.when(jnp.logical_not(is_last))
            def _():
                out_ref[0, 0] = tile_sum(r1_ref, r2_ref, tile_rows)

            @pl.when(is_last)
            def _():
                # Reduce only the valid prefix of the overhanging last tile.
                out_ref[0, 0] = tile_sum(r1_ref, r2_ref, last_tile_rows)

    return kernel


@functools.partial(jax.jit, static_argnames=("reduction",))
def closs(r1: jax.Array, r2: jax.Array, reduction: str = "mean") -> jax.Array:
    """Equivalent of nn.MSELoss(reduction=reduction)(r1, r2)."""
    assert r1.shape == r2.shape, "CLoss expects same-shaped inputs"
    n_elems = r1.size

    flat1 = jnp.ravel(r1)
    flat2 = jnp.ravel(r2)

    # Lane pad to a multiple of 128 only when needed (zeros contribute 0 to
    # the sum of squared differences).  Ragged *tile* boundaries never pad --
    # they are handled by the static valid-prefix reduce in the kernel.
    # TODO(synk): for element counts not divisible by 128 this pad is one
    # extra HBM round trip; a manual-DMA tail path could remove it.
    lane_pad = (-n_elems) % LANES
    if lane_pad:
        flat1 = jnp.pad(flat1, (0, lane_pad))
        flat2 = jnp.pad(flat2, (0, lane_pad))

    rows = flat1.size // LANES
    slab1 = flat1.reshape(rows, LANES)
    slab2 = flat2.reshape(rows, LANES)

    # Minimum sublane multiple depends on dtype packing:
    # 8 rows for 4-byte dtypes, 16 for bf16, 32 for int8/fp8.
    min_itemsize = min(slab1.dtype.itemsize, slab2.dtype.itemsize)
    max_itemsize = max(slab1.dtype.itemsize, slab2.dtype.itemsize)
    row_mult = {4: 8, 2: 16, 1: 32}.get(min_itemsize, 8)

    if rows >= row_mult:
        # Byte-budgeted block: ~4 MiB for the widest input.
        budget_rows = max(row_mult,
                          _round_down(TARGET_BLOCK_BYTES // (LANES * max_itemsize),
                                      row_mult))
        # Keep >= 4 tiles when the input is big enough so both v7x
        # TensorCores get work via the "parallel" grid axis.
        split_rows = _round_down(pl.cdiv(rows, 4), row_mult)
        if split_rows >= row_mult:
            budget_rows = min(budget_rows, split_rows)
        tile_rows = min(budget_rows, _round_down(rows, row_mult))
    else:
        # Block equal to the full (tiny) array dim is always legal.
        tile_rows = rows

    num_tiles = pl.cdiv(rows, tile_rows)
    last_tile_rows = rows - (num_tiles - 1) * tile_rows  # static, >= 1

    # In-kernel chunk size: multiple of 8 sublanes, <= tile_rows when possible.
    chunk_rows = min(CHUNK_ROWS, _round_down(tile_rows, 8))
    if chunk_rows == 0:
        chunk_rows = 8  # tiny tile: everything goes through the remainder path

    kernel = _make_mse_partial_kernel(tile_rows, chunk_rows, last_tile_rows)

    # Explicit VMEM budget: 2 inputs x 2 pipeline buffers + small headroom for
    # chunk temps / output.  Stays well under v7x's 64 MiB physical VMEM.
    block_bytes_total = tile_rows * LANES * (slab1.dtype.itemsize
                                             + slab2.dtype.itemsize)
    vmem_limit_bytes = int(min(max(2 * block_bytes_total + (4 << 20),
                                   16 << 20),
                               48 << 20))

    bytes_accessed = (
        slab1.size * slab1.dtype.itemsize
        + slab2.size * slab2.dtype.itemsize
        + num_tiles * 4
    )

    partials = pl.pallas_call(
        kernel,
        out_shape=jax.ShapeDtypeStruct((num_tiles, 1), jnp.float32),
        grid_spec=pltpu.PrefetchScalarGridSpec(
            num_scalar_prefetch=0,
            grid=(num_tiles,),
            in_specs=[
                pl.BlockSpec((tile_rows, LANES), lambda i: (i, 0)),
                pl.BlockSpec((tile_rows, LANES), lambda i: (i, 0)),
            ],
            out_specs=pl.BlockSpec(
                (1, 1), lambda i: (i, 0), memory_space=pltpu.SMEM
            ),
        ),
        compiler_params=pltpu.CompilerParams(
            dimension_semantics=("parallel",),
            vmem_limit_bytes=vmem_limit_bytes,
        ),
        cost_estimate=pl.CostEstimate(
            flops=3 * n_elems, transcendentals=0, bytes_accessed=bytes_accessed
        ),
    )(slab1, slab2)

    total = jnp.sum(partials)
    if reduction == "mean":
        return (total / jnp.float32(n_elems)).astype(jnp.float32)
    elif reduction == "sum":
        return total.astype(jnp.float32)
    else:
        # TODO(synk): reduction='none' returns a full per-element tensor; not
        # needed for the default CLoss() configuration.
        raise ValueError(f"unsupported reduction: {reduction}")


if __name__ == "__main__":
    key = jax.random.PRNGKey(0)
    k1, k2, k3, k4, k5, k6 = jax.random.split(key, 6)

    # Primary check: image-like retinex components, NCHW [2, 4, 16, 16].
    r1 = jax.random.normal(k1, (2, 4, 16, 16), dtype=jnp.float32)
    r2 = jax.random.normal(k2, (2, 4, 16, 16), dtype=jnp.float32)
    out = jax.block_until_ready(closs(r1, r2))
    ref = jnp.mean((r1 - r2) ** 2)
    assert jnp.allclose(out, ref, rtol=1e-5, atol=1e-6), (out, ref)

    # Ragged-size check: exercises lane padding, a multi-step grid and the
    # static valid-prefix reduce on the overhanging last tile.
    a = jax.random.normal(k3, (2, 3, 20, 20), dtype=jnp.float32)
    b = jax.random.normal(k4, (2, 3, 20, 20), dtype=jnp.float32)
    out2 = jax.block_until_ready(closs(a, b))
    ref2 = jnp.mean((a - b) ** 2)
    assert jnp.allclose(out2, ref2, rtol=1e-5, atol=1e-6), (out2, ref2)

    # Multi-tile check: exercises the 4-way ("parallel") grid split and the
    # in-kernel chunked fori_loop reduce.
    c = jax.random.normal(k5, (2, 4, 32, 64), dtype=jnp.float32)
    d = jax.random.normal(k6, (2, 4, 32, 64), dtype=jnp.float32)
    out3 = jax.block_until_ready(closs(c, d))
    ref3 = jnp.mean((c - d) ** 2)
    assert jnp.allclose(out3, ref3, rtol=1e-5, atol=1e-6), (out3, ref3)

    print("KERNEL_OK")
</pallas_src>

<mosaic_0001>
module attributes {stable_mosaic.version = 11 : i64} {
  func.func @kernel(%arg0: i32, %arg1: memref<16x128xf32, #tpu.memory_space<vmem>>, %arg2: memref<16x128xf32, #tpu.memory_space<vmem>>, %arg3: memref<1x1xf32, #tpu.memory_space<smem>>) attributes {dimension_semantics = [#tpu.dimension_semantics<parallel>], iteration_bounds = array<i64: 1>, scalar_prefetch = 0 : i64, scratch_operands = 0 : i64, tpu.core_type = #tpu.core_type<tc>, window_params = [{transform_indices = @transform_0, window_bounds = array<i64: 16, 128>}, {transform_indices = @transform_1, window_bounds = array<i64: 16, 128>}, {transform_indices = @transform_2, window_bounds = array<i64: 1, 1>}]} {
    %cst = arith.constant 0.000000e+00 : f32
    %0 = vector.broadcast %cst : f32 to vector<8x128xf32>
    %c0_i32 = arith.constant 0 : i32
    %c16_i32 = arith.constant 16 : i32
    %1 = arith.muli %c0_i32, %c16_i32 : i32
    %2 = tpu.assume_multiple %1, 16 : i32
    %3 = arith.index_cast %2 : i32 to index
    %c0 = arith.constant 0 : index
    %4 = vector.load %arg1[%3, %c0] : memref<16x128xf32, #tpu.memory_space<vmem>>, vector<16x128xf32>
    %5 = arith.index_cast %2 : i32 to index
    %c0_0 = arith.constant 0 : index
    %6 = vector.load %arg2[%5, %c0_0] : memref<16x128xf32, #tpu.memory_space<vmem>>, vector<16x128xf32>
    %7 = arith.subf %4, %6 : vector<16x128xf32>
    %8 = arith.mulf %7, %7 : vector<16x128xf32>
    %9 = vector.shape_cast %8 : vector<16x128xf32> to vector<2x8x128xf32>
    %cst_1 = arith.constant dense<0.000000e+00> : vector<8x128xf32>
    %10 = vector.multi_reduction <add>, %9, %cst_1 [0] : vector<2x8x128xf32> to vector<8x128xf32>
    %11 = arith.addf %0, %10 : vector<8x128xf32>
    %c1_i32 = arith.constant 1 : i32
    %12 = vector.shape_cast %11 : vector<8x128xf32> to vector<1x8x128xf32>
    %cst_2 = arith.constant dense<0.000000e+00> : vector<1xf32>
    %13 = vector.multi_reduction <add>, %12, %cst_2 [1, 2] : vector<1x8x128xf32> to vector<1xf32>
    %14 = vector.shape_cast %13 : vector<1xf32> to vector<1x1x1xf32>
    %15 = vector.extract %14[0, 0, 0] : f32 from vector<1x1x1xf32>
    %c0_3 = arith.constant 0 : index
    %c0_4 = arith.constant 0 : index
    %16 = memref.load %arg3[%c0_3, %c0_4] : memref<1x1xf32, #tpu.memory_space<smem>>
    memref.store %15, %arg3[%c0_3, %c0_4] : memref<1x1xf32, #tpu.memory_space<smem>>
    return
  }
  func.func @transform_0(%arg0: i32) -> (i32, i32) {
    %c0_i32 = arith.constant 0 : i32
    %c0_i32_0 = arith.constant 0 : i32
    return %arg0, %c0_i32 : i32, i32
  }
  func.func @transform_1(%arg0: i32) -> (i32, i32) {
    %c0_i32 = arith.constant 0 : i32
    %c0_i32_0 = arith.constant 0 : i32
    return %arg0, %c0_i32 : i32, i32
  }
  func.func @transform_2(%arg0: i32) -> (i32, i32) {
    %c0_i32 = arith.constant 0 : i32
    %c0_i32_0 = arith.constant 0 : i32
    return %arg0, %c0_i32 : i32, i32
  }
}

</mosaic_0001>

<bundles_post_ra>
// kernel: closs.1
= control target key start
LH: loop header
LB: loop body
LE: loop exit
PB: predicated region body
PF: predicated region fallthrough
CT: control target
= control target key end

     0   :  { %s101_s0 = inlined_call_operand.vmem [shape: f32[16,128], index: 0, kind: input, shape index: {}]   ;;  %s102_s1 = inlined_call_operand.vmem [shape: f32[16,128], index: 1, kind: input, shape index: {}]   ;;  %s103_s2 = inlined_call_operand.hbm [shape: f32[1,1], index: 2, kind: output, shape index: {}]  }
   0x1   :  { %v12_v0 = vld [vmem:[%s101_s0] sm:$0xff]  ;;  %v13_v1 = vld [vmem:[%s101_s0 + $0x8] sm:$0xff] }
   0x2   :  { %v14_v2 = vld [vmem:[%s102_s1] sm:$0xff]  ;;  %v15_v3 = vld [vmem:[%s102_s1 + $0x8] sm:$0xff] }
   0x3   :  { %v16_v4 = vsub.f32 %v12_v0, %v14_v2 }
   0x4   :  { %7 = vsyncpa [#allocation3], 0  ;;  %v17_v5 = vsub.f32 %v13_v1, %v15_v3  ;;  %s49_s1 = scalar_lea.hbm %s103_s2, 16 }
   0x5   :  { %v18_v6 = vmul.f32 %v16_v4, %v16_v4  ;;  %p50_p0 = scmp.ne.s32.totalorder %s103_s2, %s49_s1  ;;  %p53_p1 = scmp.lt.u32.totalorder %s49_s1, %s103_s2 }
   0x6   :  { %v19_v7 = vmul.f32 %v17_v5, %v17_v5 }
   0x7   :  { %p55_p2 = pnand %p53_p1, %p50_p0 }
   0x8   :  { %v20_v8 = vadd.f32 %v19_v7, %v18_v6 }
   0xa   :  { %22 = vadd.xlane.f32.xlu0 %v20_v8 }
  0x97   :  { %v23_v9 = vpop.xlane.xlu0 %22 }
  0x98   :  { %v24_v10 = vrot.slane %v23_v9, 4 }
  0x9a   :  { %v25_v11 = vadd.f32 %v24_v10, %v23_v9 }
  0x9c   :  { %v26_v12 = vrot.slane %v25_v11, 2 }
  0x9e   :  { %v27_v13 = vadd.f32 %v26_v12, %v25_v11 }
  0xa0   :  { %v28_v14 = vrot.slane %v27_v13, 1 }
  0xa2   :  { %v29_v15 = vadd.f32 %v28_v14, %v27_v13 }
  0xa4   :  { %46 = vpush %v29_v15 }
  0xd5   :  { %s47_s0 = spop %46 }
  0xd6   :  { %32 = sst [smem:[#allocation2]] %s47_s0 }
  0xd7   :  { %58 = shalt.err (!%p55_p2)
}
  0xd8   :  { %s61_s23 = smov [#allocation2]  }
  0xd9   :  { %40 = dma.smem_to_hbm %s61_s23, 16, %s103_s2, [#allocation3]  }
  0xda   :  { %59 = dma.done.wait [#allocation3], 16  }
  0xdb   :  { %60 = vsyncadd [#allocation3], 4294967280 }
  0xdc   :  { %44 = sfence }
  0xdd   :  { %45 = vsyncpa [#allocation3], 1 }

</bundles_post_ra>
